<compile_context>
chip_gen: v7x
topology: tpu7x:2x2x1
jax: 0.10.0
libtpu: 0.0.40
codegen_flags: <defaults>
</compile_context>

<pallas_src>
import math

import jax
import jax.numpy as jnp
from jax import lax
from jax.experimental import pallas as pl
from jax.experimental.pallas import tpu as pltpu


_VMEM_LIMIT_BYTES = 32 * 1024 * 1024   # explicit scoped-VMEM request (<= physical on all chips)


def _attention_kernel(x_ref, wqkv_ref, b_ref, o_ref, qkv_ref):
    """x_ref: (nb, S, D) compute dtype; wqkv_ref: (D, 3*HP) compute dtype;
    b_ref: (1, 3*HP) f32; o_ref: (nb, S, HP); qkv_ref: VMEM scratch (nb, S, 3*HP)."""
    nb, S, D = x_ref.shape
    hp = o_ref.shape[-1]

    # Whole-block fused QKV projection: ONE (nb*S, D) x (D, 3*HP) MXU matmul.
    # (Hoisted out of the batch loop: nb*S rows per MXU push, single bias broadcast.)
    x_all = x_ref[...].reshape(nb * S, D)
    qkv = jnp.dot(x_all, wqkv_ref[...], preferred_element_type=jnp.float32) + b_ref[...]
    qkv_ref[...] = qkv.reshape(nb, S, 3 * hp).astype(qkv_ref.dtype)

    # Per-batch attention (scores / softmax / PV) as a real loop — bounded live ranges
    # and flat code size instead of the previous static Python unroll.
    @pl.loop(0, nb)
    def _(b):
        qkv_b = qkv_ref[b]                         # (S, 3*HP); dynamic leading index
        q = qkv_b[:, 0 * hp:1 * hp]                # vreg-aligned 128-lane slices
        k = qkv_b[:, 1 * hp:2 * hp]
        v = qkv_b[:, 2 * hp:3 * hp]

        # NT scores Q @ K^T (1/sqrt(H) pre-folded into the query columns).
        # TODO(synk): confirm via pl.lower_as_mlir that this NT contraction does not emit
        # a per-iteration XLU transpose of K; if it does, produce K transposed instead.
        scores = lax.dot_general(q, k, (((1,), (1,)), ((), ())),
                                 preferred_element_type=jnp.float32)      # (S, S) f32

        # Numerically stable softmax; statistics stay in f32.
        m = jnp.max(scores, axis=-1, keepdims=True)
        e = jnp.exp(scores - m)                                           # (S, S) f32
        denom = jnp.sum(e, axis=-1, keepdims=True)                        # (S, 1) f32

        # PV first, normalize afterwards: keeps the VPU multiply off the critical path in
        # front of the MXU; the reciprocal goes to the otherwise-idle EUP.
        pv = jnp.dot(e.astype(v.dtype), v, preferred_element_type=jnp.float32)   # (S, HP)
        out = pv * pl.reciprocal(denom, approx=True)
        o_ref[b] = out.astype(o_ref.dtype)


def _vmem_budget_bytes():
    """Per-kernel block-sizing budget derived from the actual chip (v7x: 64 MiB physical,
    v5e/v6e: 128 MiB); conservative fallback when tracing off-TPU / AOT."""
    try:
        phys = int(pltpu.get_tpu_info().vmem_capacity_bytes)
    except Exception:
        phys = 64 * 1024 * 1024
    return min(phys // 4, _VMEM_LIMIT_BYTES // 2)


def _choose_b_block(B, S, D, HP, compute_itemsize, budget_bytes):
    """Largest batch block that (a) fits the VMEM budget and (b) keeps >= 2 grid steps
    whenever B > 1 (software pipelining on single-TC chips, megacore sharding on v7x),
    amortizing the ~0.35 us per-grid-step overhead with multi-batch blocks."""
    per_b = (2 * S * D * compute_itemsize        # double-buffered x block
             + 2 * S * HP * 4                    # double-buffered output block (f32 worst case)
             + S * 3 * HP * compute_itemsize     # fused-qkv VMEM scratch
             + 6 * S * max(S, HP) * 4)           # f32 intermediates (scores/exp/pv) + slack
    cap = max(1, budget_bytes // max(per_b, 1))
    best = 1
    for cand in range(1, B + 1):
        if B % cand:
            continue
        if cand <= cap and (B // cand >= 2 or B == 1):
            best = cand
    return best


def prepare_attention_params(wq, bq, wk, bk, wv, bv, mxu_dtype=None):
    """One-time parameter prep (run OUTSIDE the hot path): fold the 1/sqrt(H) softmax
    scale into the query projection, zero-pad each projection to a 128-lane boundary, and
    fuse Q/K/V into one (D, 3*HP) weight + (1, 3*HP) bias. Optional mxu_dtype (e.g.
    jnp.bfloat16 on v6e/v7x) casts the matmul operands; bias / softmax stats stay f32."""
    D, H = wq.shape
    HP = ((H + 127) // 128) * 128
    scale = 1.0 / math.sqrt(float(H))            # TRUE hidden dim, not the padded width

    def pad_w(w):
        return jnp.pad(w, ((0, 0), (0, HP - H)))

    def pad_b(b):
        return jnp.pad(b, (0, HP - H))

    wqkv = jnp.concatenate([pad_w(wq * scale), pad_w(wk), pad_w(wv)], axis=1)      # (D, 3*HP)
    bqkv = jnp.concatenate([pad_b(bq * scale), pad_b(bk), pad_b(bv)])
    bqkv = bqkv.reshape(1, 3 * HP).astype(jnp.float32)
    if mxu_dtype is not None:
        wqkv = wqkv.astype(mxu_dtype)
    return wqkv, bqkv


def attention_block_prepared(x, wqkv, bqkv, hidden_dim, *, keep_padded=False):
    """Hot-path forward: pure pallas_call on pre-fused/padded params.
    x: (B, S, D). wqkv: (D, 3*HP). bqkv: (1, 3*HP) f32. Returns (B, S, hidden_dim),
    or the lane-dense (B, S, HP) slab when keep_padded=True (padded lanes are zero)."""
    B, S, D = x.shape
    HP = wqkv.shape[1] // 3
    out_dtype = x.dtype
    compute_dtype = wqkv.dtype
    if x.dtype != compute_dtype:
        x = x.astype(compute_dtype)              # e.g. bf16 MXU operands on v6e/v7x

    b_block = _choose_b_block(B, S, D, HP, jnp.dtype(compute_dtype).itemsize,
                              _vmem_budget_bytes())
    grid = (B // b_block,)

    out_padded = pl.pallas_call(
        _attention_kernel,
        out_shape=jax.ShapeDtypeStruct((B, S, HP), out_dtype),
        grid_spec=pltpu.PrefetchScalarGridSpec(
            num_scalar_prefetch=0,
            grid=grid,
            in_specs=[
                pl.BlockSpec((b_block, S, D), lambda i: (i, 0, 0)),     # x
                pl.BlockSpec((D, 3 * HP), lambda i: (0, 0)),            # fused W_qkv
                pl.BlockSpec((1, 3 * HP), lambda i: (0, 0)),            # fused bias (f32)
            ],
            out_specs=pl.BlockSpec((b_block, S, HP), lambda i: (i, 0, 0)),
            scratch_shapes=[pltpu.VMEM((b_block, S, 3 * HP), compute_dtype)],
        ),
        compiler_params=pltpu.CompilerParams(
            dimension_semantics=("parallel",),
            vmem_limit_bytes=_VMEM_LIMIT_BYTES,
        ),
    )(x, wqkv, bqkv)

    if keep_padded:
        # Padded lanes [hidden_dim:HP] are exactly zero; downstream consumers that accept
        # the lane-dense layout skip the extra HBM read+write of the slice below.
        return out_padded
    return out_padded[:, :, :hidden_dim]


def attention_block(x, wq, bq, wk, bk, wv, bv, *, mxu_dtype=None):
    """Convenience wrapper matching the PyTorch module signature. For repeated calls, run
    prepare_attention_params() once and call attention_block_prepared() on the hot path."""
    H = wq.shape[1]
    wqkv, bqkv = prepare_attention_params(wq, bq, wk, bk, wv, bv, mxu_dtype=mxu_dtype)
    return attention_block_prepared(x, wqkv, bqkv, H)


def attention_block_ref(x, wq, bq, wk, bk, wv, bv):
    """Pure-JAX reference matching the PyTorch forward semantics."""
    q = x @ wq + bq
    k = x @ wk + bk
    v = x @ wv + bv
    scores = jnp.einsum("bsh,bth->bst", q, k) / math.sqrt(q.shape[-1])
    weights = jax.nn.softmax(scores, axis=-1)
    return jnp.einsum("bst,bth->bsh", weights, v)


if __name__ == "__main__":
    # Small shapes consistent with the module: batch=2, seq=8, input_dim=32, hidden_dim=63.
    B, S, D, H = 2, 8, 32, 63
    key = jax.random.PRNGKey(0)
    kx, kwq, kbq, kwk, kbk, kwv, kbv = jax.random.split(key, 7)

    x = jax.random.normal(kx, (B, S, D), dtype=jnp.float32)

    # Deterministic "PyTorch-like" init: uniform(-1/sqrt(D), 1/sqrt(D)).
    bound = 1.0 / math.sqrt(D)
    wq = jax.random.uniform(kwq, (D, H), jnp.float32, -bound, bound)
    bq = jax.random.uniform(kbq, (H,), jnp.float32, -bound, bound)
    wk = jax.random.uniform(kwk, (D, H), jnp.float32, -bound, bound)
    bk = jax.random.uniform(kbk, (H,), jnp.float32, -bound, bound)
    wv = jax.random.uniform(kwv, (D, H), jnp.float32, -bound, bound)
    bv = jax.random.uniform(kbv, (H,), jnp.float32, -bound, bound)

    ref = attention_block_ref(x, wq, bq, wk, bk, wv, bv)

    # One-time parameter prep (hoisted off the hot path), then the pure-pallas_call forward.
    wqkv, bqkv = prepare_attention_params(wq, bq, wk, bk, wv, bv)
    out = jax.block_until_ready(attention_block_prepared(x, wqkv, bqkv, H))
    assert out.shape == (B, S, H), out.shape
    # Tolerance accounts for the approximate EUP reciprocal in the softmax normalization.
    assert jnp.allclose(out, ref, atol=2e-3, rtol=2e-3), float(jnp.max(jnp.abs(out - ref)))

    # bf16-MXU-operand path (v6e/v7x feedback): bf16 matmul inputs, f32 accumulation and
    # f32 softmax statistics; checked against the f32 reference with a bf16-level tolerance.
    wqkv16, bqkv16 = prepare_attention_params(wq, bq, wk, bk, wv, bv, mxu_dtype=jnp.bfloat16)
    out16 = jax.block_until_ready(attention_block_prepared(x, wqkv16, bqkv16, H))
    assert out16.shape == (B, S, H), out16.shape
    err16 = float(jnp.max(jnp.abs(out16.astype(jnp.float32) - ref)))
    assert jnp.allclose(out16.astype(jnp.float32), ref, atol=5e-2, rtol=5e-2), err16

    print("KERNEL_OK")
</pallas_src>

<mosaic_0001>
module attributes {stable_mosaic.version = 11 : i64} {
  func.func @_attention_kernel(%arg0: i32, %arg1: memref<1x8x32xf32, #tpu.memory_space<vmem>>, %arg2: memref<32x384xf32, #tpu.memory_space<vmem>>, %arg3: memref<1x384xf32, #tpu.memory_space<vmem>>, %arg4: memref<1x8x128xf32, #tpu.memory_space<vmem>>, %arg5: memref<1x8x384xf32, #tpu.memory_space<vmem>>) attributes {dimension_semantics = [#tpu.dimension_semantics<parallel>], iteration_bounds = array<i64: 2>, scalar_prefetch = 0 : i64, scratch_operands = 1 : i64, tpu.core_type = #tpu.core_type<tc>, window_params = [{transform_indices = @transform_0, window_bounds = array<i64: 1, 8, 32>}, {pipeline_mode = #tpu.pipeline_mode<synchronous>, transform_indices = @transform_1, window_bounds = array<i64: 32, 384>}, {pipeline_mode = #tpu.pipeline_mode<synchronous>, transform_indices = @transform_2, window_bounds = array<i64: 1, 384>}, {transform_indices = @transform_3, window_bounds = array<i64: 1, 8, 128>}]} {
    %c0 = arith.constant 0 : index
    %c0_0 = arith.constant 0 : index
    %c0_1 = arith.constant 0 : index
    %0 = vector.load %arg1[%c0, %c0_0, %c0_1] : memref<1x8x32xf32, #tpu.memory_space<vmem>>, vector<1x8x32xf32>
    %1 = vector.shape_cast %0 : vector<1x8x32xf32> to vector<8x32xf32>
    %c0_2 = arith.constant 0 : index
    %c0_3 = arith.constant 0 : index
    %2 = vector.load %arg2[%c0_2, %c0_3] : memref<32x384xf32, #tpu.memory_space<vmem>>, vector<32x384xf32>
    %cst = arith.constant dense<0.000000e+00> : vector<8x384xf32>
    %3 = tpu.matmul %1, %2, %cst {dimension_numbers = #tpu.dot_dimension_numbers<[1], [0], [0], [1], [0, 0, 1, 1], [], []>} : vector<8x32xf32>, vector<32x384xf32>, vector<8x384xf32> -> vector<8x384xf32>
    %c0_4 = arith.constant 0 : index
    %c0_5 = arith.constant 0 : index
    %4 = vector.load %arg3[%c0_4, %c0_5] : memref<1x384xf32, #tpu.memory_space<vmem>>, vector<1x384xf32>
    %5 = vector.broadcast %4 : vector<1x384xf32> to vector<8x384xf32>
    %6 = arith.addf %3, %5 : vector<8x384xf32>
    %7 = vector.shape_cast %6 : vector<8x384xf32> to vector<1x8x384xf32>
    %c0_6 = arith.constant 0 : index
    %c0_7 = arith.constant 0 : index
    %c0_8 = arith.constant 0 : index
    %8 = vector.load %arg5[%c0_6, %c0_7, %c0_8] : memref<1x8x384xf32, #tpu.memory_space<vmem>>, vector<1x8x384xf32>
    tpu.vector_store %arg5[%c0_6, %c0_7, %c0_8], %7 {strides = array<i32>} : memref<1x8x384xf32, #tpu.memory_space<vmem>>, vector<1x8x384xf32>,
    %c0_i32 = arith.constant 0 : i32
    %c1_i32 = arith.constant 1 : i32
    %9 = arith.muli %c0_i32, %c1_i32 : i32
    %c0_i32_9 = arith.constant 0 : i32
    %10 = arith.addi %c0_i32_9, %9 : i32
    %11 = arith.index_cast %10 : i32 to index
    %c0_10 = arith.constant 0 : index
    %c0_11 = arith.constant 0 : index
    %12 = vector.load %arg5[%11, %c0_10, %c0_11] : memref<1x8x384xf32, #tpu.memory_space<vmem>>, vector<1x8x384xf32>
    %13 = vector.shape_cast %12 : vector<1x8x384xf32> to vector<8x384xf32>
    %14 = vector.extract_strided_slice %13 {offsets = [0, 0], sizes = [8, 128], strides = [1, 1]} : vector<8x384xf32> to vector<8x128xf32>
    %15 = vector.extract_strided_slice %13 {offsets = [0, 128], sizes = [8, 128], strides = [1, 1]} : vector<8x384xf32> to vector<8x128xf32>
    %16 = vector.extract_strided_slice %13 {offsets = [0, 256], sizes = [8, 128], strides = [1, 1]} : vector<8x384xf32> to vector<8x128xf32>
    %cst_12 = arith.constant dense<0.000000e+00> : vector<8x8xf32>
    %17 = tpu.matmul %14, %15, %cst_12 {dimension_numbers = #tpu.dot_dimension_numbers<[1], [1], [0], [0], [0, 0, 1, 0], [], []>} : vector<8x128xf32>, vector<8x128xf32>, vector<8x8xf32> -> vector<8x8xf32>
    %cst_13 = arith.constant dense<0xFF800000> : vector<8xf32>
    %18 = vector.multi_reduction <maximumf>, %17, %cst_13 [1] : vector<8x8xf32> to vector<8xf32>
    %19 = vector.shape_cast %18 : vector<8xf32> to vector<8x1xf32>
    %20 = vector.broadcast %19 : vector<8x1xf32> to vector<8x8xf32>
    %21 = arith.subf %17, %20 : vector<8x8xf32>
    %22 = math.exp %21 : vector<8x8xf32>
    %cst_14 = arith.constant dense<0.000000e+00> : vector<8xf32>
    %23 = vector.multi_reduction <add>, %22, %cst_14 [1] : vector<8x8xf32> to vector<8xf32>
    %24 = vector.shape_cast %23 : vector<8xf32> to vector<8x1xf32>
    %cst_15 = arith.constant dense<0.000000e+00> : vector<8x128xf32>
    %25 = tpu.matmul %22, %16, %cst_15 {dimension_numbers = #tpu.dot_dimension_numbers<[1], [0], [0], [1], [0, 0, 1, 1], [], []>} : vector<8x8xf32>, vector<8x128xf32>, vector<8x128xf32> -> vector<8x128xf32>
    %26 = tpu.reciprocal %24 {approx = true} : vector<8x1xf32> -> vector<8x1xf32>
    %27 = vector.broadcast %26 : vector<8x1xf32> to vector<8x128xf32>
    %28 = arith.mulf %25, %27 : vector<8x128xf32>
    %29 = arith.index_cast %10 : i32 to index
    %c0_16 = arith.constant 0 : index
    %c0_17 = arith.constant 0 : index
    %30 = vector.load %arg4[%29, %c0_16, %c0_17] : memref<1x8x128xf32, #tpu.memory_space<vmem>>, vector<1x8x128xf32>
    %31 = vector.shape_cast %30 : vector<1x8x128xf32> to vector<8x128xf32>
    %32 = vector.shape_cast %28 : vector<8x128xf32> to vector<1x8x128xf32>
    tpu.vector_store %arg4[%29, %c0_16, %c0_17], %32 {strides = array<i32>} : memref<1x8x128xf32, #tpu.memory_space<vmem>>, vector<1x8x128xf32>,
    %c1_i32_18 = arith.constant 1 : i32
    return
  }
  func.func @transform_0(%arg0: i32) -> (i32, i32, i32) {
    %c0_i32 = arith.constant 0 : i32
    %c0_i32_0 = arith.constant 0 : i32
    %c0_i32_1 = arith.constant 0 : i32
    return %arg0, %c0_i32, %c0_i32_0 : i32, i32, i32
  }
  func.func @transform_1(%arg0: i32) -> (i32, i32) {
    %c0_i32 = arith.constant 0 : i32
    %c0_i32_0 = arith.constant 0 : i32
    %c0_i32_1 = arith.constant 0 : i32
    return %c0_i32, %c0_i32_0 : i32, i32
  }
  func.func @transform_2(%arg0: i32) -> (i32, i32) {
    %c0_i32 = arith.constant 0 : i32
    %c0_i32_0 = arith.constant 0 : i32
    %c0_i32_1 = arith.constant 0 : i32
    return %c0_i32, %c0_i32_0 : i32, i32
  }
  func.func @transform_3(%arg0: i32) -> (i32, i32, i32) {
    %c0_i32 = arith.constant 0 : i32
    %c0_i32_0 = arith.constant 0 : i32
    %c0_i32_1 = arith.constant 0 : i32
    return %arg0, %c0_i32, %c0_i32_0 : i32, i32, i32
  }
}

</mosaic_0001>

<bundles_post_ra>
// kernel: tpu_custom_call.1
= control target key start
LH: loop header
LB: loop body
LE: loop exit
PB: predicated region body
PF: predicated region fallthrough
CT: control target
= control target key end

     0   :  { %8 = vsyncpa [#allocation4], 0  ;;  %s1128_s0 = inlined_call_operand.hbm [shape: f32[2,8,32], index: 0, kind: input, shape index: {}]   ;;  %s1129_s1 = inlined_call_operand.hbm [shape: f32[32,384], index: 1, kind: input, shape index: {}]   ;;  %s1130_s2 = inlined_call_operand.vmem [shape: f32[1,384], index: 2, kind: input, shape index: {}]   ;;  %s1131_s3 = inlined_call_operand.hbm [shape: f32[2,8,128], index: 3, kind: output, shape index: {}]  }
   0x1   :  { %10 = vsyncpa [#allocation4 + $0x1], 0 }
   0x2   :  { %11 = vsyncpa [#allocation7], 0 }
   0x3   :  { %12 = vsyncpa [#allocation5], 0 }
   0x4   :  { %14 = vsyncpa [#allocation5 + $0x1], 0  ;;  %s917_s12 = smov 0   ;;  %s919_s13 = smov 0  }
   0x5   :  { %s921_s14 = smov 0   ;;  %s923_s15 = smov 0  }
   0x6 LB: > { %s938_s16 = sadd.s32 4294967295, %s887_s15   ;;  %s632_s17 = sadd.s32 4294967294, %s887_s15   ;;  %s887_s15 = sphi %s923_s15, %s1151_s15   ;;  %s883_s14 = sphi %s921_s14, %s1150_s14   ;;  %s879_s13 = sphi %s919_s13, %s1149_s13   ;;  %s875_s12 = sphi %s917_s12, %s1148_s12  }
   0x7   : > { %p40_p0 = scmp.ne.s32.totalorder %s879_s13, %s875_s12  ;;  %p1132_p1 = scmp.eq.s32.totalorder %s938_s16, 0 }
   0x8   : > { %p112_p3 = scmp.eq.s32.totalorder %s632_s17, 1  ;;  %p633_p5 = scmp.ge.s32.totalorder %s887_s15, 1 }
   0x9   : > { %p947_p4 = por %p1132_p1, %p40_p0  ;;  %p119_p7 = scmp.lt.s32.totalorder %s887_s15, 3 }
   0xa   : > { %p952_p6 = por %p112_p3, %p40_p0  ;;  %s889_s21 = smov [#allocation6]  }
   0xb   : > { %s1135_s18 = scalar_select %p947_p4, 1, 0 }
   0xc   : > { %s1136_s19 = scalar_select %p952_p6, 1, 0 }
   0xd   : > { %p957_p8 = pnand %p633_p5, %p119_p7  ;;  %s131_s22 = sshll.u32 %s889_s21, 4  ;;  %s961_s22 = int_to_ptr.vmem [resolvable:$true] %s131_s22 }
   0xe   : > { %s973_s24 = sadd.s32 1, %s887_s15   ;;  %s27_s25 = sadd.s32 1, %s883_s14 }
   0xf   : > { %s1137_s20 = scalar_select %p957_p8, 1, 0 }
  0x10   : > { %p701_p9 = pneg %p957_p8  ;;  %s24_s26 = ssub.s32 %s887_s15, %s973_s24 }
  0x11   : > { %s759_s29 = scalar_lea.hbm %s1129_s1, 1536 }
  0x12   : > { %p968_p11 = pnand %p701_p9, %p1132_p1  ;;  %p760_p12 = scmp.ne.s32.totalorder %s1129_s1, %s759_s29 }
  0x13   : > { %p766_p5 = scmp.lt.u32.totalorder %s759_s29, %s1129_s1 }
  0x14   : > { %p761_p13 = pneg %p968_p11 }
  0x16   : > { %p762_p0 = pnand %p761_p13, %p760_p12 }
  0x18   : > { %p763_p3 = pneg %p762_p0 }
  0x1a   : > { %p768_p7 = pnand %p766_p5, %p763_p3 }
  0x1c   : > { %771 = shalt.err (!%p768_p7)
}
  0x1d   : > { %s772_s7 = scalar_lea.vmem %s961_s22, 1536  ;;  %p780_p2 = scmp.lt.s32.totalorder %s961_s22, %s961_s22 }
  0x1e   : > { %p773_p9 = scmp.ne.s32.totalorder %s961_s22, %s772_s7  ;;  %p781_p6 = scmp.lt.s32.totalorder %s772_s7, %s772_s7 }
  0x20   : > { %p775_p10 = pnand %p773_p9, %p761_p13  ;;  %p782_p4 = por %p781_p6, %p780_p2 }
  0x22   : > { %p776_p1 = pneg %p775_p10 }
  0x24   : > { %p783_p8 = pnand %p782_p4, %p776_p1 }
  0x26   : > { %786 = shalt.err (!%p783_p8)
}
  0x27   : > { %s890_s8 = smov 384   ;;  %s891_s9 = smov 24  }
  0x28   : > { %704 = dma.hbm_to_vmem [thread:$0]  (!%p968_p11), %s1129_s1, 1536, %s961_s22, [#allocation7], %s890_s8, %s890_s8, %s891_s9  }
  0x29   : > { %p25_p2 = scmp.eq.s32.totalorder %s24_s26, 0  ;;  %p34_p1 = scmp.ne.s32.totalorder %s883_s14, %s879_s13 }
  0x2a   : > { %p35_p4 = scmp.eq.s32.totalorder %s887_s15, 0  ;;  %p714_p6 = scmp.lt.s32.totalorder %s887_s15, 2 }
  0x2b   : > { %s1004_s17 = scalar_select %p25_p2, %s883_s14, %s27_s25  }
  0x2c   : > { %p36_p8 = por %p35_p4, %p34_p1  ;;  %p1139_p10 = scmp.eq.s32.totalorder %s938_s16, 1 }
  0x2d   : > { %s148_s27 = sand.u32 1, %s883_s14   ;;  %s637_s28 = sshll.u32 %s887_s15, 7 }
  0x2e   : > { %p1008_p12 = por %p1139_p10, %p34_p1  ;;  %s636_s29 = sshll.u32 %s148_s27, 3 }
  0x2f   : > { %s1017_s4 = scalar_lea.hbm %s1128_s0, %s637_s28  ;;  %s152_s22 = scalar_lea.vmem [#allocation3], %s636_s29 }
  0x30   : > { %s159_s25 = sshll.u32 %s152_s22, 4  ;;  %p1019_p11 = pnand %p714_p6, %p36_p8  ;;  %s1023_s25 = int_to_ptr.vmem [resolvable:$true] %s159_s25 }
  0x31   : > { %s149_s5 = scalar_lea.sflag [#allocation4], %s148_s27  ;;  %s787_s6 = scalar_lea.hbm %s1017_s4, 128 }
  0x32   : > { %p788_p13 = scmp.ne.s32.totalorder %s1017_s4, %s787_s6  ;;  %p789_p0 = pneg %p1019_p11 }
  0x33   : > { %s792_s9 = scalar_lea.hbm %s1128_s0, 256  ;;  %p793_p7 = scmp.lt.u32.totalorder %s1017_s4, %s1128_s0 }
  0x34   : > { %p790_p3 = pnand %p789_p0, %p788_p13  ;;  %p794_p9 = scmp.lt.u32.totalorder %s792_s9, %s787_s6 }
  0x35   : > { %p796_p1 = scmp.lt.u32.totalorder %s787_s6, %s1017_s4 }
  0x36   : > { %p791_p5 = pneg %p790_p3  ;;  %p795_p2 = por %p794_p9, %p793_p7 }
  0x38   : > { %p797_p4 = por %p796_p1, %p795_p2 }
  0x3a   : > { %p798_p6 = pnand %p797_p4, %p791_p5 }
  0x3c   : > { %801 = shalt.err (!%p798_p6)
}
  0x3d   : > { %s802_s27 = scalar_lea.vmem %s1023_s25, 128  ;;  %s892_s28 = smov [#allocation3]  }
  0x3e   : > { %p803_p8 = scmp.ne.s32.totalorder %s1023_s25, %s802_s27  ;;  %s807_s29 = sshll.u32 %s892_s28, 4  ;;  %s808_s29 = int_to_ptr.vmem [resolvable:$false] %s807_s29 }
  0x3f   : > { %s809_s23 = scalar_lea.vmem %s808_s29, 256  ;;  %p810_p3 = scmp.lt.s32.totalorder %s1023_s25, %s808_s29 }
  0x40   : > { %p805_p10 = pnand %p803_p8, %p789_p0  ;;  %p811_p7 = scmp.lt.s32.totalorder %s809_s23, %s802_s27 }
  0x42   : > { %p806_p13 = pneg %p805_p10  ;;  %p812_p9 = por %p811_p7, %p810_p3 }
  0x44   : > { %p813_p2 = pnand %p812_p9, %p806_p13 }
  0x46   : > { %816 = shalt.err (!%p813_p2)
}
  0x47   : > { %708 = dma.hbm_to_vmem [thread:$0]  (!%p1019_p11), %s1017_s4, 128, %s1023_s25, %s149_s5  }
  0x48   : > { %p1142_p5 = scmp.ne.s32.totalorder %s1137_s20, 0 }
  0x49   : > { %s1053_s30 = sand.u32 (!%p1142_p5), 1, %s879_s13   ;;  %p1143_p0 = scmp.ne.s32.totalorder (!%p1142_p5), %s1135_s18, 0 }
  0x4a   : > { %168 = sbr.rel (%p1142_p5) target bundleno = 912 (0x390), region = 32  ;;  %s639_s22 = sshll.u32 (!%p1142_p5), %s1053_s30, 3 }
  0x4b   : > { %s171_s6 = scalar_lea.sflag (!%p1142_p5), [#allocation4], %s1053_s30  ;;  %s174_s7 = scalar_lea.vmem (!%p1142_p5), [#allocation3], %s639_s22 }
  0x51   : > { %862 = dma.done.wait (%p1143_p0), %s171_s6, 128  }
  0x52   : > { %864 = vsyncadd (%p1143_p0), %s171_s6, 4294967168  ;;  %p1144_p11 = scmp.eq.s32.totalorder %s938_s16, 0 }
  0x54   : > { %866 = dma.done.wait (%p1144_p11), [#allocation7], 1536   ;;  %p1145_p1 = pmov %p1144_p11 }
  0x55   : > { %v893_v0 = vmov 0.0   ;;  %v203_v1 = vld [vmem:[#allocation6 + $0x8] sm:$0xff]  ;;  %v206_v2 = vld [vmem:[#allocation6 + $0x20] sm:$0xff]  ;;  %v205_v5 = vld [vmem:[#allocation6 + $0x18] sm:$0xff]  ;;  %vm231_vm0 = vcmask 261120   ;;  %vm894_vm1 = vmmov 0   ;;  %v216_v21 = vlaneseq }
  0x56   : > { %868 = vsyncadd (%p1145_p1), [#allocation7], 4294965760  ;;  %299 = vmatprep.mubr.f32.mxu0 %v893_v0  ;;  %v202_v3 = vld [vmem:[#allocation6] sm:$0xff]  ;;  %v679_v4 = vpack.c.bf16 %v206_v2, %v203_v1  ;;  %v209_v6 = vld [vmem:[#allocation6 + $0x38] sm:$0xff]  ;;  %666 = vmatprep.mubr.msk.f32.mxu1 %vm894_vm1, %v893_v0  ;;  %v895_v17 = vmov 0.0|0.0   ;;  %vm452_vm2 = vcmask 64512  }
  0x57   : > { %v212_v7 = vld [vmem:[#allocation6 + $0x50] sm:$0xff]  ;;  %v681_v8 = vpack.c.bf16 %v205_v5, %v202_v3  ;;  %v211_v11 = vld [vmem:[#allocation6 + $0x48] sm:$0xff]  ;;  %v210_v16 = vld [vmem:[#allocation6 + $0x40] sm:$0xff]  ;;  %687 = vmatprep.subr.bf16.mxu1 %v895_v17  ;;  %v217_v22 = vshrl.u32 %v216_v21, 7  ;;  %s646_s4 = sshll.u32 %s938_s16, 7  ;;  %s200_s25 = scalar_lea.vmem [#allocation8], %s639_s22 }
  0x58   : > { %v683_v9 = vpack.c.bf16 %v212_v7, %v209_v6  ;;  %v208_v10 = vld [vmem:[#allocation6 + $0x30] sm:$0xff]  ;;  %680 = vmatprep.subr.bf16.mxu0 %v679_v4  ;;  %v207_v15 = vld [vmem:[#allocation6 + $0x28] sm:$0xff]  ;;  %v213_v19 = vld [vmem:[#allocation6 + $0x58] sm:$0xff]  ;;  %s552_s26 = sshll.u32 %s200_s25, 4  ;;  %s1084_s9 = scalar_lea.hbm %s1131_s3, %s646_s4  ;;  %s1086_s26 = int_to_ptr.vmem [resolvable:$true] %s552_s26 }
  0x59   : > { %682 = vmatpush1.bf16.msra.mxu0 %v681_v8  ;;  %v685_v12 = vpack.c.bf16 %v211_v11, %v208_v10  ;;  %v201_v13 = vld [vmem:[%s174_s7] sm:$0xff]  ;;  %v691_v20 = vpack.c.bf16 %v213_v19, %v210_v16  ;;  %v222_v23 = vsub.s32 1, %v217_v22  ;;  %v218_v25 = vsub.s32 0, %v217_v22  ;;  %s539_s10 = scalar_lea.sflag [#allocation5], %s1053_s30  ;;  %s817_s16 = scalar_lea.vmem %s1086_s26, 128 }
  0x5a   : > { %684 = vmatprep.subr.bf16.mxu0 %v683_v9  ;;  %v204_v14 = vld [vmem:[#allocation6 + $0x10] sm:$0xff]  ;;  %v226_v35 = vsub.s32 2, %v217_v22  ;;  %p818_p4 = scmp.ne.s32.totalorder %s1086_s26, %s817_s16  ;;  %s896_s11 = smov [#allocation8]  }
  0x5b   : > { %v688_v18 = vpack.c.bf16 %v207_v15, %v204_v14  ;;  %v214_v24 = vld [vmem:[%s1130_s2] sm:$0x7]  ;;  %s821_s27 = sshll.u32 %s896_s11, 4  ;;  %s822_s27 = int_to_ptr.vmem [resolvable:$false] %s821_s27 }
  0x5c   : > { %v223_v26 = vrot.slane %v214_v24, %v222_v23  ;;  %v219_v28 = vrot.slane %v214_v24, %v218_v25  ;;  %v227_v38 = vrot.slane %v214_v24, %v226_v35  ;;  %p819_p6 = pnand %p818_p4, %p1008_p12  ;;  %s823_s28 = scalar_lea.vmem %s822_s27, 256 }
  0x5d   : > { %686 = vmatpush1.bf16.msra.mxu0 %v685_v12  ;;  %689 = vmatpush3.bf16.msra.mxu1 %v688_v18  ;;  %p824_p10 = scmp.lt.s32.totalorder %s1086_s26, %s822_s27  ;;  %p825_p13 = scmp.lt.s32.totalorder %s823_s28, %s817_s16 }
  0x5e   : > { %669 = vmatprep.subr.mxu0 %v893_v0  ;;  %690 = vmatprep.subr.bf16.mxu1 %v895_v17  ;;  %p820_p8 = pneg %p819_p6 }
  0x5f   : > { %p826_p3 = por %p825_p13, %p824_p10 }
  0x60   : > { %642 = vmatmul.mubr.msk.f32.vlgmr.msra.gmra.mrb[0].mxu0 %vm231_vm0, %v201_v13 }
  0x61   : > { %671 = vmatprep.mubr.msk.f32.mxu0 %vm894_vm1, %v893_v0  ;;  %692 = vmatpush3.bf16.msra.mxu1 %v691_v20  ;;  %p827_p7 = pnand %p826_p3, %p820_p8 }
  0x62   : > { %674 = vmatprep.subr.mxu1 %v893_v0 }
  0x64   : > { %667 = vmatmul.mubr.msk.f32.vlgmr.msra.gmra.mrb[0].mxu1 %vm231_vm0, %v201_v13 }
  0x65   : > { %676 = vmatprep.mubr.msk.f32.mxu1 %vm894_vm1, %v893_v0 }
 0x133   : > { %v301_v27 = vpop.f32.mrb[0].mxu0 }
 0x134   : > { %v303_v29 = vpop.f32.mrb[1].mxu0  ;;  %v302_v31 = vadd.f32 %v301_v27, %v219_v28 }
 0x135   : > { %v304_v30 = vadd.f32 %v303_v29, %v223_v26 }
 0x137   : > { %670 = vmatpush3.xpose.msra.mxu0 %v304_v30  ;;  %v372_v36 = vpop.f32.mrb[0].mxu1 }
 0x138   : > { %v668_v37 = vpop.f32.mrb[1].mxu1  ;;  %v373_v39 = vadd.f32 %v372_v36, %v227_v38 }
 0x13a   : > { %672 = vmatmul.mubr.f32.vlgmr.msra.gmra.mrb[2].mxu0 %v302_v31  ;;  %675 = vmatpush3.msra.mxu1 %v373_v39 }
 0x20d   : > { %v448_v32 = vpop.f32.mrb[2].mxu0 }
 0x20e   : > { %v673_v33 = vpop.f32.mrb[3].mxu0  ;;  %v453_v34 = vsel %vm452_vm2, %v448_v32, -inf }
 0x20f   : > { %454 = vmax.xlane.f32.xlu0 %v453_v34 }
 0x29c   : > { %v455_v40 = vpop.xlane.xlu0 %454 }
 0x29d   : > { %v456_v41 = vsub.f32 %v448_v32, %v455_v40 }
 0x29f   : > { %v457_v42 = vmul.f32 1.442695, %v456_v41 }
 0x2a1   : > { %755 = vpow2.f32 %v457_v42 }
 0x2ab   : > { %v756_v43 = vpop.eup %755 }
 0x2ac   : > { %677 = vmatmul.mubr.msk.f32.vlgmr.msra.gmra.mrb[2].mxu1 %vm452_vm2, %v756_v43  ;;  %v459_v44 = vsel %vm452_vm2, %v756_v43, 0.0 }
 0x2ad   : > { %460 = vadd.xlane.f32.xlu0 %v459_v44 }
 0x33a   : > { %v461_v45 = vpop.xlane.xlu0 %460 }
 0x33b   : > { %757 = vrcp.f32 %v461_v45 }
 0x345   : > { %v758_v46 = vpop.eup %757 }
 0x37f   : > { %v531_v47 = vpop.f32.mrb[2].mxu1 }
 0x380   : > { %v536_v48 = vmul.f32 %v758_v46, %v531_v47  ;;  %v678_v49 = vpop.f32.mrb[3].mxu1 }
 0x382   : > { %537 = vst [vmem:[%s200_s25] sm:$0xff] %v536_v48 }
 0x383   : > { %830 = shalt.err (!%p827_p7)
}
 0x384   : > { %s831_s29 = scalar_lea.hbm %s1084_s9, 128  ;;  %s835_s22 = scalar_lea.hbm %s1131_s3, 256 }
 0x385   : > { %p832_p9 = scmp.ne.s32.totalorder %s1084_s9, %s831_s29  ;;  %p836_p0 = scmp.lt.u32.totalorder %s1084_s9, %s1131_s3 }
 0x386   : > { %p837_p11 = scmp.lt.u32.totalorder %s835_s22, %s831_s29  ;;  %p839_p4 = scmp.lt.u32.totalorder %s831_s29, %s1084_s9 }
 0x387   : > { %p833_p2 = pnand %p832_p9, %p1008_p12 }
 0x388   : > { %p838_p1 = por %p837_p11, %p836_p0 }
 0x389   : > { %p834_p5 = pneg %p833_p2 }
 0x38a   : > { %p840_p6 = por %p839_p4, %p838_p1 }
 0x38c   : > { %p841_p8 = pnand %p840_p6, %p834_p5 }
 0x38e   : > { %844 = shalt.err (!%p841_p8)
}
 0x38f   : > { %699 = dma.vmem_to_hbm [thread:$0]  (%p1008_p12), %s1086_s26, 128, %s1084_s9, %s539_s10  }
 0x390 PF: > { %s564_s18 = sand.u32 1, %s875_s12   ;;  %p1146_p10 = scmp.ne.s32.totalorder %s1136_s19, 0 }
 0x391   : > { %p1147_p13 = scmp.ge.s32.totalorder %s887_s15, 2  ;;  %s565_s20 = scalar_lea.sflag [#allocation5], %s564_s18 }
 0x393   : > { %p710_p3 = pnand %p1147_p13, %p1146_p10 }
 0x395   : > { %870 = dma.done.wait (!%p710_p3), %s565_s20, 128  }
 0x396   : > { %872 = vsyncadd (!%p710_p3), %s565_s20, 4294967168  ;;  %p17_p7 = scmp.ge.s32.totalorder %s973_s24, 4   ;;  %s1148_s12 = smov %s879_s13 }
 0x397   : > { %s1149_s13 = smov %s883_s14  ;;  %s1150_s14 = smov %s1004_s17 }
 0x398   : > { %s1151_s15 = smov %s973_s24  ;;  %19 = sbr.rel (!%p17_p7) target bundleno = 6 (0x6), region = 81 }
 0x39f   :  { %570 = vsyncpa [#allocation4], 1 }
 0x3a0   :  { %572 = vsyncpa [#allocation4 + $0x1], 1 }
 0x3a1   :  { %573 = vsyncpa [#allocation7], 1 }
 0x3a2   :  { %574 = vsyncpa [#allocation5], 1 }
 0x3a3   :  { %576 = vsyncpa [#allocation5 + $0x1], 1 }

</bundles_post_ra>
